<compile_context>
chip_gen: v5e
topology: v5e:2x2
jax: 0.10.0
libtpu: 0.0.40
codegen_flags: <defaults>
</compile_context>

<pallas_src>
import jax
import jax.numpy as jnp
from jax.experimental import pallas as pl
from jax.experimental.pallas import tpu as pltpu

N_EMBD = 16
HIDDEN = N_EMBD * 4   # 64
DROPOUT = 0.2         # unused at inference

# Tokens per grid step.  At 16384: in/out blocks (double-buffered) ~4 MiB plus
# the (tile_m, HIDDEN) f32 intermediate ~4 MiB and temps -> ~12-14 MiB, safely
# inside the 32 MiB scoped VMEM we request (v5e/v6e/v7x all have >=64 MiB phys).
TILE_M_MAX = 16384
# Below this many tokens, a single block is used (splitting only adds per-step
# overhead at these sizes).
SINGLE_TILE_MAX = 1024


def _round_up(n, m):
    return ((n + m - 1) // m) * m


def _ffn_kernel(x_ref, w1t_ref, b1_ref, w2t_ref, b2_ref, o_ref):
    # Native token-major layout:
    #   x  : (tile_m, E)  f32      w1t: (E, HIDDEN) bf16   b1: (1, HIDDEN) f32
    #   w2t: (HIDDEN, E)  f32      b2 : (1, E)      f32    o : (tile_m, E)
    x = x_ref[...].astype(jnp.bfloat16)                       # cast in-kernel (hidden under DMA)
    h = jnp.dot(x, w1t_ref[...], preferred_element_type=jnp.float32)   # (tile_m, HIDDEN) f32
    h = jnp.maximum(h + b1_ref[...], 0.0)                     # bias + ReLU in f32
    # Second matmul kept fully f32 (no second bf16 rounding of the activation).
    y = jnp.dot(h, w2t_ref[...], preferred_element_type=jnp.float32)   # (tile_m, E) f32
    # Dropout in eval mode is identity.
    o_ref[...] = (y + b2_ref[...]).astype(o_ref.dtype)


def feed_forward(x, w1, b1, w2, b2, out_dtype=None):
    """Eval-mode FFN.

    x : (B, T, n_embd)
    w1: (HIDDEN, n_embd), b1: (HIDDEN,)     -- PyTorch nn.Linear layout (out, in)
    w2: (n_embd, HIDDEN), b2: (n_embd,)
    out_dtype: output dtype (default: x.dtype).  Use jnp.bfloat16 to halve the
               kernel's HBM write traffic if the consumer tolerates it.
    returns (B, T, n_embd) in out_dtype
    """
    B, T, E = x.shape
    assert E == N_EMBD
    M = B * T
    out_dtype = x.dtype if out_dtype is None else out_dtype

    # Free (metadata-only) reshape; no transpose, no cast, no pad.
    x2d = x.reshape(M, E)

    # Tile selection: single block for small M; otherwise >=2 grid steps
    # (both TCs busy on v7x) capped at TILE_M_MAX, multiple of 128.
    if M <= SINGLE_TILE_MAX:
        tile_m = M                                  # block dims == array dims (always legal)
    else:
        tile_m = min(TILE_M_MAX, _round_up(pl.cdiv(M, 2), 128))
    grid = (pl.cdiv(M, tile_m),)                    # ragged last block handled by Pallas

    # Weight layout plumbing is one-time and tiny (~5 KB); in practice weights
    # would be stored pre-transposed.
    w1t = w1.T.astype(jnp.bfloat16)                 # (E, HIDDEN)
    w2t = w2.T.astype(jnp.float32)                  # (HIDDEN, E) — kept f32
    b1_row = b1.astype(jnp.float32).reshape(1, HIDDEN)
    b2_row = b2.astype(jnp.float32).reshape(1, E)

    out_bytes = jnp.dtype(out_dtype).itemsize
    flops = 4 * M * E * HIDDEN                      # two matmuls, 2*M*K*N each
    bytes_accessed = (M * E * x2d.dtype.itemsize    # x in
                      + M * E * out_bytes           # y out
                      + w1t.size * 2 + w2t.size * 4
                      + (b1_row.size + b2_row.size) * 4)

    y2d = pl.pallas_call(
        _ffn_kernel,
        out_shape=jax.ShapeDtypeStruct((M, E), out_dtype),
        grid_spec=pltpu.PrefetchScalarGridSpec(
            num_scalar_prefetch=0,
            grid=grid,
            in_specs=[
                pl.BlockSpec((tile_m, E), lambda i: (i, 0)),     # x tile (pipelined)
                pl.BlockSpec((E, HIDDEN), lambda i: (0, 0)),     # W1^T (resident, ~2 KB)
                pl.BlockSpec((1, HIDDEN), lambda i: (0, 0)),     # b1
                pl.BlockSpec((HIDDEN, E), lambda i: (0, 0)),     # W2^T (resident, ~4 KB)
                pl.BlockSpec((1, E), lambda i: (0, 0)),          # b2
            ],
            out_specs=pl.BlockSpec((tile_m, E), lambda i: (i, 0)),
        ),
        compiler_params=pltpu.CompilerParams(
            dimension_semantics=("parallel",),
            vmem_limit_bytes=32 * 1024 * 1024),
        cost_estimate=pl.CostEstimate(
            flops=flops, transcendentals=0, bytes_accessed=bytes_accessed),
    )(x2d, w1t, b1_row, w2t, b2_row)

    return y2d.reshape(B, T, E)


def init_params(key):
    """Deterministic init matching nn.Linear (out, in) layout."""
    k1, k2, k3, k4 = jax.random.split(key, 4)
    lim1 = 1.0 / (N_EMBD ** 0.5)   # fan_in = n_embd
    lim2 = 1.0 / (HIDDEN ** 0.5)   # fan_in = hidden
    w1 = jax.random.uniform(k1, (HIDDEN, N_EMBD), jnp.float32, -lim1, lim1)
    b1 = jax.random.uniform(k2, (HIDDEN,), jnp.float32, -lim1, lim1)
    w2 = jax.random.uniform(k3, (N_EMBD, HIDDEN), jnp.float32, -lim2, lim2)
    b2 = jax.random.uniform(k4, (N_EMBD,), jnp.float32, -lim2, lim2)
    return w1, b1, w2, b2


if __name__ == "__main__":
    key = jax.random.PRNGKey(0)
    kx, kp = jax.random.split(key)
    B, T = 2, 8
    x = jax.random.normal(kx, (B, T, N_EMBD), jnp.float32)
    w1, b1, w2, b2 = init_params(kp)

    y = feed_forward(x, w1, b1, w2, b2)
    jax.block_until_ready(y)

    # Pure-JAX f32 reference (eval-mode FFN). Kernel casts x/W1 to bf16 for the
    # first matmul (f32 accumulation, f32 second matmul), so allow bf16-level
    # tolerance.
    x2d = x.reshape(-1, N_EMBD)
    ref = jnp.maximum(x2d @ w1.T + b1, 0.0) @ w2.T + b2
    ref = ref.reshape(B, T, N_EMBD)
    assert y.shape == ref.shape and y.dtype == jnp.float32
    assert jnp.allclose(y, ref, atol=2e-2, rtol=2e-2), "mismatch vs reference"

    print("KERNEL_OK")
</pallas_src>

<mosaic_0001>
module attributes {stable_mosaic.version = 11 : i64} {
  func.func @_ffn_kernel(%arg0: i32, %arg1: memref<16x16xf32, #tpu.memory_space<vmem>>, %arg2: memref<16x64xbf16, #tpu.memory_space<vmem>>, %arg3: memref<1x64xf32, #tpu.memory_space<vmem>>, %arg4: memref<64x16xf32, #tpu.memory_space<vmem>>, %arg5: memref<1x16xf32, #tpu.memory_space<vmem>>, %arg6: memref<16x16xf32, #tpu.memory_space<vmem>>) attributes {dimension_semantics = [#tpu.dimension_semantics<parallel>], iteration_bounds = array<i64: 1>, scalar_prefetch = 0 : i64, scratch_operands = 0 : i64, tpu.core_type = #tpu.core_type<tc>, window_params = [{transform_indices = @transform_0, window_bounds = array<i64: 16, 16>}, {pipeline_mode = #tpu.pipeline_mode<synchronous>, transform_indices = @transform_1, window_bounds = array<i64: 16, 64>}, {pipeline_mode = #tpu.pipeline_mode<synchronous>, transform_indices = @transform_2, window_bounds = array<i64: 1, 64>}, {pipeline_mode = #tpu.pipeline_mode<synchronous>, transform_indices = @transform_3, window_bounds = array<i64: 64, 16>}, {pipeline_mode = #tpu.pipeline_mode<synchronous>, transform_indices = @transform_4, window_bounds = array<i64: 1, 16>}, {transform_indices = @transform_5, window_bounds = array<i64: 16, 16>}]} {
    %c0 = arith.constant 0 : index
    %c0_0 = arith.constant 0 : index
    %0 = vector.load %arg1[%c0, %c0_0] : memref<16x16xf32, #tpu.memory_space<vmem>>, vector<16x16xf32>
    %1 = arith.truncf %0 : vector<16x16xf32> to vector<16x16xbf16>
    %c0_1 = arith.constant 0 : index
    %c0_2 = arith.constant 0 : index
    %2 = vector.load %arg2[%c0_1, %c0_2] : memref<16x64xbf16, #tpu.memory_space<vmem>>, vector<16x64xbf16>
    %cst = arith.constant dense<0.000000e+00> : vector<16x64xf32>
    %3 = tpu.matmul %1, %2, %cst {dimension_numbers = #tpu.dot_dimension_numbers<[1], [0], [0], [1], [0, 0, 1, 1], [], []>} : vector<16x16xbf16>, vector<16x64xbf16>, vector<16x64xf32> -> vector<16x64xf32>
    %c0_3 = arith.constant 0 : index
    %c0_4 = arith.constant 0 : index
    %4 = vector.load %arg3[%c0_3, %c0_4] : memref<1x64xf32, #tpu.memory_space<vmem>>, vector<1x64xf32>
    %5 = vector.broadcast %4 : vector<1x64xf32> to vector<16x64xf32>
    %6 = arith.addf %3, %5 : vector<16x64xf32>
    %cst_5 = arith.constant 0.000000e+00 : f32
    %7 = vector.broadcast %cst_5 : f32 to vector<16x64xf32>
    %8 = arith.maximumf %6, %7 : vector<16x64xf32>
    %c0_6 = arith.constant 0 : index
    %c0_7 = arith.constant 0 : index
    %9 = vector.load %arg4[%c0_6, %c0_7] : memref<64x16xf32, #tpu.memory_space<vmem>>, vector<64x16xf32>
    %cst_8 = arith.constant dense<0.000000e+00> : vector<16x16xf32>
    %10 = tpu.matmul %8, %9, %cst_8 {dimension_numbers = #tpu.dot_dimension_numbers<[1], [0], [0], [1], [0, 0, 1, 1], [], []>} : vector<16x64xf32>, vector<64x16xf32>, vector<16x16xf32> -> vector<16x16xf32>
    %c0_9 = arith.constant 0 : index
    %c0_10 = arith.constant 0 : index
    %11 = vector.load %arg5[%c0_9, %c0_10] : memref<1x16xf32, #tpu.memory_space<vmem>>, vector<1x16xf32>
    %12 = vector.broadcast %11 : vector<1x16xf32> to vector<16x16xf32>
    %13 = arith.addf %10, %12 : vector<16x16xf32>
    %c0_11 = arith.constant 0 : index
    %c0_12 = arith.constant 0 : index
    %14 = vector.load %arg6[%c0_11, %c0_12] : memref<16x16xf32, #tpu.memory_space<vmem>>, vector<16x16xf32>
    tpu.vector_store %arg6[%c0_11, %c0_12], %13 {strides = array<i32>} : memref<16x16xf32, #tpu.memory_space<vmem>>, vector<16x16xf32>,
    return
  }
  func.func @transform_0(%arg0: i32) -> (i32, i32) {
    %c0_i32 = arith.constant 0 : i32
    %c0_i32_0 = arith.constant 0 : i32
    return %arg0, %c0_i32 : i32, i32
  }
  func.func @transform_1(%arg0: i32) -> (i32, i32) {
    %c0_i32 = arith.constant 0 : i32
    %c0_i32_0 = arith.constant 0 : i32
    %c0_i32_1 = arith.constant 0 : i32
    return %c0_i32, %c0_i32_0 : i32, i32
  }
  func.func @transform_2(%arg0: i32) -> (i32, i32) {
    %c0_i32 = arith.constant 0 : i32
    %c0_i32_0 = arith.constant 0 : i32
    %c0_i32_1 = arith.constant 0 : i32
    return %c0_i32, %c0_i32_0 : i32, i32
  }
  func.func @transform_3(%arg0: i32) -> (i32, i32) {
    %c0_i32 = arith.constant 0 : i32
    %c0_i32_0 = arith.constant 0 : i32
    %c0_i32_1 = arith.constant 0 : i32
    return %c0_i32, %c0_i32_0 : i32, i32
  }
  func.func @transform_4(%arg0: i32) -> (i32, i32) {
    %c0_i32 = arith.constant 0 : i32
    %c0_i32_0 = arith.constant 0 : i32
    %c0_i32_1 = arith.constant 0 : i32
    return %c0_i32, %c0_i32_0 : i32, i32
  }
  func.func @transform_5(%arg0: i32) -> (i32, i32) {
    %c0_i32 = arith.constant 0 : i32
    %c0_i32_0 = arith.constant 0 : i32
    return %arg0, %c0_i32 : i32, i32
  }
}

</mosaic_0001>

<bundles_post_ra>
// kernel: tpu_custom_call.1
= control target key start
LH: loop header
LB: loop body
LE: loop exit
PB: predicated region body
PF: predicated region fallthrough
CT: control target
= control target key end

     0   :  { %vm37_vm0 = vcmask 130048   ;;  %s244_s0 = inlined_call_operand.vmem [shape: f32[16,16], index: 0, kind: input, shape index: {}]   ;;  %s245_s1 = inlined_call_operand.vmem [shape: bf16[16,64], index: 1, kind: input, shape index: {}]   ;;  %s246_s2 = inlined_call_operand.vmem [shape: f32[1,64], index: 2, kind: input, shape index: {}]   ;;  %s247_s3 = inlined_call_operand.vmem [shape: f32[64,16], index: 3, kind: input, shape index: {}]   ;;  %s248_s4 = inlined_call_operand.vmem [shape: f32[1,16], index: 4, kind: input, shape index: {}]   ;;  %s249_s5 = inlined_call_operand.hbm [shape: f32[16,16], index: 5, kind: output, shape index: {}]  }
   0x1   :  { %v126_v0 = vld [vmem:[%s245_s1] sm:$0xff]  ;;  %v23_v2 = vld [vmem:[%s244_s0 + $0x8] sm:$0xff]  ;;  %v64_v4 = vld [vmem:[%s247_s3 + $0x38] sm:$0xff] }
   0x2   :  { %v22_v1 = vld [vmem:[%s244_s0] sm:$0xff]  ;;  %v63_v5 = vld [vmem:[%s247_s3 + $0x30] sm:$0xff]  ;;  %48 = vmatpush.bf16.msra.mxu0 %v126_v0  ;;  %84 = vmatpush.msra.mxu1 %v64_v4  ;;  %v62_v6 = vld [vmem:[%s247_s3 + $0x28] sm:$0xff] }
   0x3   :  { %v24_v3 = vpack.c.bf16 %v23_v2, %v22_v1  ;;  %127 = vmatpush.msra.mxu2 %v64_v4 }
   0x4   :  { %10 = vsyncpa [#allocation3], 0  ;;  %85 = vmatpush.msra.mxu1 %v63_v5  ;;  %v61_v7 = vld [vmem:[%s247_s3 + $0x20] sm:$0xff]  ;;  %v60_v8 = vld [vmem:[%s247_s3 + $0x18] sm:$0xff]  ;;  %vm69_vm1 = vcmask 523264   ;;  %s107_s19 = sshll.u32 %s249_s5, 4  ;;  %s108_s19 = int_to_ptr.hbm [resolvable:$true] %s107_s19 }
   0x5   :  { %123 = vmatmul.msk.bf16.vlgmr.msra.gmra.mxu0 %vm37_vm0, %v24_v3  ;;  %128 = vmatpush.msra.mxu2 %v63_v5  ;;  %v59_v9 = vld [vmem:[%s247_s3 + $0x10] sm:$0xff]  ;;  %v58_v10 = vld [vmem:[%s247_s3 + $0x8] sm:$0xff]  ;;  %v57_v11 = vld [vmem:[%s247_s3] sm:$0xff]  ;;  %s166_s3 = smov [#allocation2]   ;;  %s167_s20 = smov 128  }
   0x6   :  { %86 = vmatpush.msra.mxu1 %v62_v6  ;;  %v138_v12 = vld [vmem:[%s246_s2] ss:$0 sm:$0xff]  ;;  %s105_s17 = sshll.u32 %s166_s3, 4  ;;  %s168_s21 = smov 8   ;;  %s106_s17 = int_to_ptr.vmem [resolvable:$true] %s105_s17 }
   0x7   :  { %129 = vmatpush.msra.mxu2 %v62_v6  ;;  %v139_v19 = vld [vmem:[%s248_s4] ss:$0 sm:$0xff] }
   0x8   :  { %87 = vmatpush.msra.mxu1 %v61_v7 }
   0x9   :  { %130 = vmatpush.msra.mxu2 %v61_v7 }
   0xa   :  { %88 = vmatpush.msra.mxu1 %v60_v8 }
   0xb   :  { %131 = vmatpush.msra.mxu2 %v60_v8 }
   0xc   :  { %89 = vmatpush.msra.mxu1 %v59_v9 }
   0xd   :  { %132 = vmatpush.msra.mxu2 %v59_v9 }
   0xe   :  { %90 = vmatpush.msra.mxu1 %v58_v10 }
   0xf   :  { %133 = vmatpush.msra.mxu2 %v58_v10 }
  0x10   :  { %91 = vmatpush.msra.mxu1 %v57_v11 }
  0x11   :  { %134 = vmatpush.msra.mxu2 %v57_v11 }
  0x82   :  { %v50_v13 = vpop.f32.mrf.mxu0 }
  0x83   :  { %v51_v14 = vadd.f32 %v138_v12, %v50_v13 }
  0x85   :  { %v55_v15 = vmax.f32 %v51_v14, 0.0 }
  0x87   :  { %124 = vmatmul.msk.f32.vlgmr.msra.gmra.mxu1 %vm69_vm1, %v55_v15 }
  0x8a   :  { %v52_v16 = vpop.f32.mrf.mxu0 }
  0x8b   :  { %v53_v17 = vadd.f32 %v138_v12, %v52_v16 }
  0x8d   :  { %v56_v18 = vmax.f32 %v53_v17, 0.0 }
  0x8f   :  { %125 = vmatmul.msk.f32.vlgmr.msra.gmra.mxu2 %vm69_vm1, %v56_v18 }
 0x104   :  { %v93_v20 = vpop.f32.mrf.mxu1 }
 0x105   :  { %v94_v21 = vadd.f32 %v139_v19, %v93_v20 }
 0x107   :  { %99 = vst.msk [vmem:[#allocation2] sm:$0xff] %vm37_vm0, %v94_v21 }
 0x112   :  { %v96_v22 = vpop.f32.mrf.mxu2 }
 0x113   :  { %v97_v23 = vadd.f32 %v139_v19, %v96_v22 }
 0x115   :  { %100 = vst.msk [vmem:[#allocation2 + $0x8] sm:$0xff] %vm37_vm0, %v97_v23 }
 0x116   :  { %113 = dma.vmem_to_hbm [thread:$0]  %s106_s17, 256, %s108_s19, [#allocation3], %s167_s20, %s167_s20, %s168_s21  }
 0x117   :  { %164 = dma.done.wait [#allocation3], 256  }
 0x118   :  { %165 = vsyncadd [#allocation3], 4294967040 }
 0x119   :  { %118 = vsyncpa [#allocation3], 1 }

</bundles_post_ra>
